<compile_context>
chip_gen: v6e
topology: v6e:2x2x1
jax: 0.10.0
libtpu: 0.0.40
codegen_flags: <defaults>
</compile_context>

<pallas_src>
import jax
import jax.numpy as jnp
from jax import lax
from jax.experimental import pallas as pl
from jax.experimental.pallas import tpu as pltpu

_MiB = 1 << 20


def _vmem_capacity_bytes():
    try:
        return int(pltpu.get_tpu_info().vmem_capacity_bytes)
    except Exception:
        return 64 * _MiB          # conservative fallback (v7x per-core VMEM)


def _divisors(n):
    return [d for d in range(1, n + 1) if n % d == 0]


def _interp_matrix(n, shift):
    """M[i, j] = linear-interp weight of source index j for output index i
    when sampling a length-n signal at position (i + shift); zero outside
    [0, n-1] (== F.grid_sample, align_corners=True, padding_mode='zeros')."""
    pos = jnp.arange(n, dtype=jnp.float32) + shift
    j0 = jnp.floor(pos)
    f = pos - j0
    cols = jnp.arange(n, dtype=jnp.float32)[None, :]
    j0c = j0[:, None]
    fc = f[:, None]
    return (jnp.where(cols == j0c, 1.0 - fc, 0.0)
            + jnp.where(cols == j0c + 1.0, fc, 0.0))


# --------------------------------------------------------------------------
# Kernel 1: separable center-of-mass reductions (lane-dense depth streaming).
# --------------------------------------------------------------------------
def _reduce_kernel(lw_ref, lh_ref, ld_ref, x_ref, y_ref, part_ref):
    # lw, lh: (1, HW) f32 ; ld: (dblk, 1) f32
    # x, y:   (C, dblk, HW) f32 blocks ; part: (1, 1, 8) f32 (resident, axis 1)
    @pl.when(pl.program_id(1) == 0)
    def _():
        part_ref[...] = jnp.zeros_like(part_ref)

    lw = lw_ref[...]
    lh = lh_ref[...]
    ld = ld_ref[...]

    def partials(v):
        m = jnp.sum(v, axis=0)                 # (dblk, HW) all-channel mass
        v0 = v[0]                              # (dblk, HW) channel 0 only
        return (jnp.sum(m),
                jnp.sum(v0 * lw),
                jnp.sum(v0 * lh),
                jnp.sum(v0 * ld))

    vals = partials(x_ref[...]) + partials(y_ref[...])   # 8 scalars
    lane = lax.broadcasted_iota(jnp.int32, (1, 1, 8), 2)
    acc = jnp.zeros((1, 1, 8), jnp.float32)
    for k, v in enumerate(vals):
        acc = acc + jnp.where(lane == k, v, 0.0)
    part_ref[...] += acc                        # single accumulate per step


# --------------------------------------------------------------------------
# Kernel 2: width + height interpolation (grid_sample, align_corners=True).
# --------------------------------------------------------------------------
def _width_height_kernel(wmT_ref, hm_ref, x_ref, o_ref):
    # wmT: (W, W) bf16 [w_in, w_out] ; hm: (H, H) bf16 [h_out, h_in]
    # x:   (1, dblk, H, W) f32       ; o:  (1, dblk, H, W) bf16
    _, dblk, H, W = x_ref.shape
    f32, bf16 = jnp.float32, jnp.bfloat16

    a_f = x_ref[0]                                            # (dblk, H, W) f32
    if H % 8 == 0:
        # width pass: ONE large 2-D MXU matmul over all dblk*H rows
        a2 = a_f.reshape(dblk * H, W).astype(bf16)            # free reshape
        aw = jnp.dot(a2, wmT_ref[...], preferred_element_type=f32)
        aw3 = aw.reshape(dblk, H, W)                          # f32, free
    else:
        # layout-unfriendly H: fall back to a batched matmul over the block
        wmT_b = jnp.broadcast_to(wmT_ref[...][None], (dblk, W, W))
        aw3 = jnp.einsum('dhw,dwv->dhv', a_f.astype(bf16), wmT_b,
                         preferred_element_type=f32)

    # height pass: batched MXU matmul over the depth block (f32 accumulation)
    hm_b = jnp.broadcast_to(hm_ref[...][None], (dblk, H, H))
    ah = jnp.einsum('duh,dhw->duw', hm_b, aw3.astype(bf16),
                    preferred_element_type=f32)
    o_ref[0] = ah.astype(o_ref.dtype)


# --------------------------------------------------------------------------
# Kernel 3: depth interpolation as a single matmul, lane-dense output.
# --------------------------------------------------------------------------
def _depth_kernel(dm_ref, x_ref, o_ref):
    # dm: (D, D) bf16 [d_out, d_in] ; x: (1, D, cblk) bf16 ; o: (1, D, cblk) f32
    o_ref[0] = jnp.dot(dm_ref[...], x_ref[0],
                       preferred_element_type=jnp.float32).astype(o_ref.dtype)


# --------------------------------------------------------------------------
# Wrapper
# --------------------------------------------------------------------------
def center_of_mass_initial_pairwise(x, y):
    """x, y: (1, C, D, H, W).  Returns (transformed_image, grid) matching the
    PyTorch module's forward; grid is (1, D, H, W, 3)."""
    assert x.ndim == 5 and y.ndim == 5
    assert x.shape[0] == 1 and y.shape[0] == 1, "affine theta batch is 1"
    assert x.shape[2:] == y.shape[2:]
    _, C, D, H, W = x.shape
    assert D > 1 and H > 1 and W > 1
    HW = H * W
    f32, bf16 = jnp.float32, jnp.bfloat16

    cap = _vmem_capacity_bytes()
    ceiling = max(16 * _MiB, min(cap - 16 * _MiB, 100 * _MiB))
    blk_budget = max(min(ceiling // 8, 8 * _MiB), 128 * 1024)

    x_f = x.astype(f32)
    y_f = y.astype(f32)
    x_4d = x_f.reshape(C, D, H, W)
    x_3d = x_f.reshape(C, D, HW)          # lane-dense view for the reductions
    y_3d = y_f.reshape(C, D, HW)

    # identity-grid 1-D coordinates (align_corners=True), flattened to HW lanes
    lin = lambda n: -1.0 + 2.0 * jnp.arange(n, dtype=f32) / (n - 1)
    lw_vec = jnp.tile(lin(W), H)[None, :]            # (1, HW)
    lh_vec = jnp.repeat(lin(H), W)[None, :]          # (1, HW)
    ld_vec = lin(D)[:, None]                         # (D, 1)

    # ---- phase 1: center-of-mass partial sums, streamed over depth --------
    # dblk is the sublane dim of the (C, dblk, HW) block: multiple of 8 or D.
    # TODO(synk): pad / remainder call for awkward D whose only valid block
    # (the whole D) exceeds the VMEM budget.
    d_cands = [d for d in _divisors(D) if d % 8 == 0 or d == D]
    fitting = [d for d in d_cands if C * d * HW * 4 <= blk_budget]
    dblk = max(fitting) if fitting else min(d_cands)
    nblocks = D // dblk
    nsplit = 2 if (nblocks >= 2 and nblocks % 2 == 0) else 1
    nper = nblocks // nsplit

    in_blk_bytes = C * dblk * HW * 4
    vmem1 = int(min(ceiling, max(4 * in_blk_bytes + 8 * _MiB, 32 * _MiB)))

    parts = pl.pallas_call(
        _reduce_kernel,
        out_shape=jax.ShapeDtypeStruct((nsplit, 1, 8), f32),
        grid_spec=pltpu.PrefetchScalarGridSpec(
            num_scalar_prefetch=0,
            grid=(nsplit, nper),
            in_specs=[
                pl.BlockSpec((1, HW), lambda s, d: (0, 0)),
                pl.BlockSpec((1, HW), lambda s, d: (0, 0)),
                pl.BlockSpec((dblk, 1), lambda s, d, n=nper: (s * n + d, 0)),
                pl.BlockSpec((C, dblk, HW), lambda s, d, n=nper: (0, s * n + d, 0)),
                pl.BlockSpec((C, dblk, HW), lambda s, d, n=nper: (0, s * n + d, 0)),
            ],
            out_specs=pl.BlockSpec((1, 1, 8), lambda s, d: (s, 0, 0)),
        ),
        compiler_params=pltpu.CompilerParams(
            dimension_semantics=("parallel", "arbitrary"),
            vmem_limit_bytes=vmem1),
    )(lw_vec, lh_vec, ld_vec, x_3d, y_3d)

    p = jnp.sum(parts, axis=(0, 1))                   # (8,)
    inv_xs = 1.0 / p[0]
    inv_ys = 1.0 / p[4]
    tx = p[1] * inv_xs - p[5] * inv_ys
    ty = p[2] * inv_xs - p[6] * inv_ys
    tz = p[3] * inv_xs - p[7] * inv_ys

    # pixel-space shifts implied by the translated identity grid
    sx = tx * ((W - 1) * 0.5)
    sy = ty * ((H - 1) * 0.5)
    sz = tz * ((D - 1) * 0.5)

    # per-axis interp matrices: hoisted out of the kernels (depend only on t)
    wmT = _interp_matrix(W, sx).T.astype(bf16)        # (W_in, W_out)
    hm = _interp_matrix(H, sy).astype(bf16)           # (H_out, H_in)
    dm = _interp_matrix(D, sz).astype(bf16)           # (D_out, D_in)

    # ---- phase 2a: width + height resample, blocked over (C, depth) -------
    cands2 = [d for d in _divisors(D) if d * HW * 4 <= blk_budget] or [1]
    dblk2 = max(cands2)
    if C * (D // dblk2) < 2:                          # keep >=2 grid steps
        smaller = [d for d in cands2 if D // d >= 2]
        if smaller:
            dblk2 = max(smaller)
    vmem2a = int(min(ceiling,
                     max(2 * (6 * dblk2 * HW) + 4 * (H * H + W * W) + 8 * _MiB,
                         32 * _MiB)))

    mid = pl.pallas_call(
        _width_height_kernel,
        out_shape=jax.ShapeDtypeStruct((C, D, H, W), bf16),
        grid_spec=pltpu.PrefetchScalarGridSpec(
            num_scalar_prefetch=0,
            grid=(C, D // dblk2),
            in_specs=[
                pl.BlockSpec((W, W), lambda c, d: (0, 0)),
                pl.BlockSpec((H, H), lambda c, d: (0, 0)),
                pl.BlockSpec((1, dblk2, H, W), lambda c, d: (c, d, 0, 0)),
            ],
            out_specs=pl.BlockSpec((1, dblk2, H, W), lambda c, d: (c, d, 0, 0)),
        ),
        compiler_params=pltpu.CompilerParams(
            dimension_semantics=("parallel", "parallel"),
            vmem_limit_bytes=vmem2a),
    )(wmT, hm, x_4d)

    # ---- phase 2b: depth resample as one matmul, lane-dense output --------
    col_cands = [c for c in range(128, HW + 1, 128) if HW % c == 0] + [HW]
    fitting_c = [c for c in col_cands if D * c * 4 <= blk_budget]
    cblk = max(fitting_c) if fitting_c else min(col_cands)
    if C * (HW // cblk) < 2:                          # keep >=2 grid steps
        smaller = [c for c in (fitting_c or col_cands) if HW // c >= 2]
        if smaller:
            cblk = max(smaller)
    vmem2b = int(min(ceiling,
                     max(2 * (6 * D * cblk) + 4 * D * D + 8 * _MiB, 32 * _MiB)))

    mid_3d = mid.reshape(C, D, HW)
    out = pl.pallas_call(
        _depth_kernel,
        out_shape=jax.ShapeDtypeStruct((C, D, HW), f32),
        grid_spec=pltpu.PrefetchScalarGridSpec(
            num_scalar_prefetch=0,
            grid=(C, HW // cblk),
            in_specs=[
                pl.BlockSpec((D, D), lambda c, j: (0, 0)),
                pl.BlockSpec((1, D, cblk), lambda c, j: (c, 0, j)),
            ],
            out_specs=pl.BlockSpec((1, D, cblk), lambda c, j: (c, 0, j)),
        ),
        compiler_params=pltpu.CompilerParams(
            dimension_semantics=("parallel", "parallel"),
            vmem_limit_bytes=vmem2b),
    )(dm, mid_3d)

    transformed = out.reshape(C, D, H, W)[None]       # (1, C, D, H, W)

    # grid = F.affine_grid(to_center_matrix) = identity grid + translation
    gx = jnp.broadcast_to(lin(W)[None, None, :], (D, H, W)) + tx
    gy = jnp.broadcast_to(lin(H)[None, :, None], (D, H, W)) + ty
    gz = jnp.broadcast_to(lin(D)[:, None, None], (D, H, W)) + tz
    grid = jnp.stack([gx, gy, gz], axis=-1)[None]     # (1, D, H, W, 3)

    return transformed, grid


# --------------------------------------------------------------------------
# Pure-JAX reference (re-derivation of the PyTorch forward) for sanity check.
# --------------------------------------------------------------------------
def _reference(x, y):
    _, C, D, H, W = x.shape
    lin = lambda n: (-1.0 + 2.0 * jnp.arange(n, dtype=jnp.float32) / (n - 1))
    cz = lin(D)[:, None, None]
    cy = lin(H)[None, :, None]
    cx = lin(W)[None, None, :]
    xs, ys = jnp.sum(x), jnp.sum(y)
    x0, y0 = x[0, 0], y[0, 0]
    tx = jnp.sum(x0 * cx) / xs - jnp.sum(y0 * cx) / ys
    ty = jnp.sum(x0 * cy) / xs - jnp.sum(y0 * cy) / ys
    tz = jnp.sum(x0 * cz) / xs - jnp.sum(y0 * cz) / ys

    def axis_interp(a, axis, n, shift):
        pos = jnp.arange(n, dtype=jnp.float32) + shift
        j0 = jnp.floor(pos)
        f = pos - j0
        j0i = j0.astype(jnp.int32)
        j1i = j0i + 1
        m0 = ((j0i >= 0) & (j0i < n)).astype(jnp.float32)
        m1 = ((j1i >= 0) & (j1i < n)).astype(jnp.float32)
        g0 = jnp.take(a, jnp.clip(j0i, 0, n - 1), axis=axis)
        g1 = jnp.take(a, jnp.clip(j1i, 0, n - 1), axis=axis)
        sh = [1] * a.ndim
        sh[axis] = n
        return ((1.0 - f) * m0).reshape(sh) * g0 + (f * m1).reshape(sh) * g1

    out = axis_interp(x, 2, D, tz * (D - 1) / 2)
    out = axis_interp(out, 3, H, ty * (H - 1) / 2)
    out = axis_interp(out, 4, W, tx * (W - 1) / 2)

    gx = jnp.broadcast_to(cx, (D, H, W)) + tx
    gy = jnp.broadcast_to(cy, (D, H, W)) + ty
    gz = jnp.broadcast_to(cz, (D, H, W)) + tz
    grid = jnp.stack([gx, gy, gz], axis=-1)[None]
    return out, grid


if __name__ == "__main__":
    key = jax.random.PRNGKey(0)
    kx, ky = jax.random.split(key)
    shape = (1, 2, 8, 16, 16)   # (N, C, D, H, W); N must be 1 (theta batch = 1)
    x = jax.random.uniform(kx, shape, dtype=jnp.float32)
    y = jax.random.uniform(ky, shape, dtype=jnp.float32)

    fwd = jax.jit(center_of_mass_initial_pairwise)
    img, grid = fwd(x, y)
    img = jax.block_until_ready(img)
    grid = jax.block_until_ready(grid)

    assert img.shape == shape, img.shape
    assert grid.shape == (1, 8, 16, 16, 3), grid.shape

    ref_img, ref_grid = _reference(x, y)
    err_img = float(jnp.max(jnp.abs(img - ref_img)))
    err_grid = float(jnp.max(jnp.abs(grid - ref_grid)))
    # bf16 MXU operands + bf16 intermediate bound absolute accuracy to ~1e-2.
    assert err_img < 4e-2, f"image mismatch: {err_img}"
    assert err_grid < 1e-4, f"grid mismatch: {err_grid}"

    print("KERNEL_OK")
</pallas_src>

<mosaic_0001>
module attributes {stable_mosaic.version = 11 : i64} {
  func.func @_reduce_kernel(%arg0: i32, %arg1: i32, %arg2: memref<1x256xf32, #tpu.memory_space<vmem>>, %arg3: memref<1x256xf32, #tpu.memory_space<vmem>>, %arg4: memref<8x1xf32, #tpu.memory_space<vmem>>, %arg5: memref<2x8x256xf32, #tpu.memory_space<vmem>>, %arg6: memref<2x8x256xf32, #tpu.memory_space<vmem>>, %arg7: memref<1x1x8xf32, #tpu.memory_space<vmem>>) attributes {dimension_semantics = [#tpu.dimension_semantics<parallel>, #tpu.dimension_semantics<arbitrary>], iteration_bounds = array<i64: 1, 1>, scalar_prefetch = 0 : i64, scratch_operands = 0 : i64, tpu.core_type = #tpu.core_type<tc>, window_params = [{pipeline_mode = #tpu.pipeline_mode<synchronous>, transform_indices = @transform_0, window_bounds = array<i64: 1, 256>}, {pipeline_mode = #tpu.pipeline_mode<synchronous>, transform_indices = @transform_1, window_bounds = array<i64: 1, 256>}, {transform_indices = @transform_2, window_bounds = array<i64: 8, 1>}, {transform_indices = @transform_3, window_bounds = array<i64: 2, 8, 256>}, {transform_indices = @transform_4, window_bounds = array<i64: 2, 8, 256>}, {transform_indices = @transform_5, window_bounds = array<i64: 1, 1, 8>}]} {
    %c0_i32 = arith.constant 0 : i32
    %0 = arith.cmpi eq, %arg1, %c0_i32 : i32
    %1 = arith.extui %0 : i1 to i32
    %c0_i32_0 = arith.constant 0 : i32
    %2 = arith.cmpi ne, %1, %c0_i32_0 : i32
    scf.if %2 {
      %cst_37 = arith.constant 0.000000e+00 : f32
      %111 = vector.broadcast %cst_37 : f32 to vector<1x1x8xf32>
      %c0_38 = arith.constant 0 : index
      %c0_39 = arith.constant 0 : index
      %c0_40 = arith.constant 0 : index
      %112 = vector.load %arg7[%c0_38, %c0_39, %c0_40] : memref<1x1x8xf32, #tpu.memory_space<vmem>>, vector<1x1x8xf32>
      tpu.vector_store %arg7[%c0_38, %c0_39, %c0_40], %111 {strides = array<i32>} : memref<1x1x8xf32, #tpu.memory_space<vmem>>, vector<1x1x8xf32>,
    } else {
    }
    %c0 = arith.constant 0 : index
    %c0_1 = arith.constant 0 : index
    %3 = vector.load %arg2[%c0, %c0_1] : memref<1x256xf32, #tpu.memory_space<vmem>>, vector<1x256xf32>
    %c0_2 = arith.constant 0 : index
    %c0_3 = arith.constant 0 : index
    %4 = vector.load %arg3[%c0_2, %c0_3] : memref<1x256xf32, #tpu.memory_space<vmem>>, vector<1x256xf32>
    %c0_4 = arith.constant 0 : index
    %c0_5 = arith.constant 0 : index
    %5 = vector.load %arg4[%c0_4, %c0_5] : memref<8x1xf32, #tpu.memory_space<vmem>>, vector<8x1xf32>
    %c0_6 = arith.constant 0 : index
    %c0_7 = arith.constant 0 : index
    %c0_8 = arith.constant 0 : index
    %6 = vector.load %arg5[%c0_6, %c0_7, %c0_8] : memref<2x8x256xf32, #tpu.memory_space<vmem>>, vector<2x8x256xf32>
    %cst = arith.constant dense<0.000000e+00> : vector<8x256xf32>
    %7 = vector.multi_reduction <add>, %6, %cst [0] : vector<2x8x256xf32> to vector<8x256xf32>
    %8 = vector.extract_strided_slice %6 {offsets = [0, 0, 0], sizes = [1, 8, 256], strides = [1, 1, 1]} : vector<2x8x256xf32> to vector<1x8x256xf32>
    %9 = vector.shape_cast %8 : vector<1x8x256xf32> to vector<8x256xf32>
    %10 = vector.shape_cast %7 : vector<8x256xf32> to vector<1x8x256xf32>
    %cst_9 = arith.constant dense<0.000000e+00> : vector<1xf32>
    %11 = vector.multi_reduction <add>, %10, %cst_9 [1, 2] : vector<1x8x256xf32> to vector<1xf32>
    %12 = vector.shape_cast %11 : vector<1xf32> to vector<1x1x1xf32>
    %13 = vector.extract %12[0, 0, 0] : f32 from vector<1x1x1xf32>
    %14 = vector.broadcast %3 : vector<1x256xf32> to vector<8x256xf32>
    %15 = arith.mulf %9, %14 : vector<8x256xf32>
    %16 = vector.shape_cast %15 : vector<8x256xf32> to vector<1x8x256xf32>
    %cst_10 = arith.constant dense<0.000000e+00> : vector<1xf32>
    %17 = vector.multi_reduction <add>, %16, %cst_10 [1, 2] : vector<1x8x256xf32> to vector<1xf32>
    %18 = vector.shape_cast %17 : vector<1xf32> to vector<1x1x1xf32>
    %19 = vector.extract %18[0, 0, 0] : f32 from vector<1x1x1xf32>
    %20 = vector.broadcast %4 : vector<1x256xf32> to vector<8x256xf32>
    %21 = arith.mulf %9, %20 : vector<8x256xf32>
    %22 = vector.shape_cast %21 : vector<8x256xf32> to vector<1x8x256xf32>
    %cst_11 = arith.constant dense<0.000000e+00> : vector<1xf32>
    %23 = vector.multi_reduction <add>, %22, %cst_11 [1, 2] : vector<1x8x256xf32> to vector<1xf32>
    %24 = vector.shape_cast %23 : vector<1xf32> to vector<1x1x1xf32>
    %25 = vector.extract %24[0, 0, 0] : f32 from vector<1x1x1xf32>
    %26 = vector.broadcast %5 : vector<8x1xf32> to vector<8x256xf32>
    %27 = arith.mulf %9, %26 : vector<8x256xf32>
    %28 = vector.shape_cast %27 : vector<8x256xf32> to vector<1x8x256xf32>
    %cst_12 = arith.constant dense<0.000000e+00> : vector<1xf32>
    %29 = vector.multi_reduction <add>, %28, %cst_12 [1, 2] : vector<1x8x256xf32> to vector<1xf32>
    %30 = vector.shape_cast %29 : vector<1xf32> to vector<1x1x1xf32>
    %31 = vector.extract %30[0, 0, 0] : f32 from vector<1x1x1xf32>
    %c0_13 = arith.constant 0 : index
    %c0_14 = arith.constant 0 : index
    %c0_15 = arith.constant 0 : index
    %32 = vector.load %arg6[%c0_13, %c0_14, %c0_15] : memref<2x8x256xf32, #tpu.memory_space<vmem>>, vector<2x8x256xf32>
    %cst_16 = arith.constant dense<0.000000e+00> : vector<8x256xf32>
    %33 = vector.multi_reduction <add>, %32, %cst_16 [0] : vector<2x8x256xf32> to vector<8x256xf32>
    %34 = vector.extract_strided_slice %32 {offsets = [0, 0, 0], sizes = [1, 8, 256], strides = [1, 1, 1]} : vector<2x8x256xf32> to vector<1x8x256xf32>
    %35 = vector.shape_cast %34 : vector<1x8x256xf32> to vector<8x256xf32>
    %36 = vector.shape_cast %33 : vector<8x256xf32> to vector<1x8x256xf32>
    %cst_17 = arith.constant dense<0.000000e+00> : vector<1xf32>
    %37 = vector.multi_reduction <add>, %36, %cst_17 [1, 2] : vector<1x8x256xf32> to vector<1xf32>
    %38 = vector.shape_cast %37 : vector<1xf32> to vector<1x1x1xf32>
    %39 = vector.extract %38[0, 0, 0] : f32 from vector<1x1x1xf32>
    %40 = vector.broadcast %3 : vector<1x256xf32> to vector<8x256xf32>
    %41 = arith.mulf %35, %40 : vector<8x256xf32>
    %42 = vector.shape_cast %41 : vector<8x256xf32> to vector<1x8x256xf32>
    %cst_18 = arith.constant dense<0.000000e+00> : vector<1xf32>
    %43 = vector.multi_reduction <add>, %42, %cst_18 [1, 2] : vector<1x8x256xf32> to vector<1xf32>
    %44 = vector.shape_cast %43 : vector<1xf32> to vector<1x1x1xf32>
    %45 = vector.extract %44[0, 0, 0] : f32 from vector<1x1x1xf32>
    %46 = vector.broadcast %4 : vector<1x256xf32> to vector<8x256xf32>
    %47 = arith.mulf %35, %46 : vector<8x256xf32>
    %48 = vector.shape_cast %47 : vector<8x256xf32> to vector<1x8x256xf32>
    %cst_19 = arith.constant dense<0.000000e+00> : vector<1xf32>
    %49 = vector.multi_reduction <add>, %48, %cst_19 [1, 2] : vector<1x8x256xf32> to vector<1xf32>
    %50 = vector.shape_cast %49 : vector<1xf32> to vector<1x1x1xf32>
    %51 = vector.extract %50[0, 0, 0] : f32 from vector<1x1x1xf32>
    %52 = vector.broadcast %5 : vector<8x1xf32> to vector<8x256xf32>
    %53 = arith.mulf %35, %52 : vector<8x256xf32>
    %54 = vector.shape_cast %53 : vector<8x256xf32> to vector<1x8x256xf32>
    %cst_20 = arith.constant dense<0.000000e+00> : vector<1xf32>
    %55 = vector.multi_reduction <add>, %54, %cst_20 [1, 2] : vector<1x8x256xf32> to vector<1xf32>
    %56 = vector.shape_cast %55 : vector<1xf32> to vector<1x1x1xf32>
    %57 = vector.extract %56[0, 0, 0] : f32 from vector<1x1x1xf32>
    %58 = tpu.iota {dimensions = array<i32: 2>} : vector<1x1x8xi32>
    %cst_21 = arith.constant 0.000000e+00 : f32
    %59 = vector.broadcast %cst_21 : f32 to vector<1x1x8xf32>
    %c0_i32_22 = arith.constant 0 : i32
    %60 = vector.broadcast %c0_i32_22 : i32 to vector<1x1x8xi32>
    %61 = arith.cmpi eq, %58, %60 : vector<1x1x8xi32>
    %cst_23 = arith.constant 0.000000e+00 : f32
    %62 = vector.broadcast %13 : f32 to vector<1x1x8xf32>
    %63 = vector.broadcast %cst_23 : f32 to vector<1x1x8xf32>
    %64 = arith.select %61, %62, %63 : vector<1x1x8xi1>, vector<1x1x8xf32>
    %65 = arith.addf %59, %64 : vector<1x1x8xf32>
    %c1_i32 = arith.constant 1 : i32
    %66 = vector.broadcast %c1_i32 : i32 to vector<1x1x8xi32>
    %67 = arith.cmpi eq, %58, %66 : vector<1x1x8xi32>
    %cst_24 = arith.constant 0.000000e+00 : f32
    %68 = vector.broadcast %19 : f32 to vector<1x1x8xf32>
    %69 = vector.broadcast %cst_24 : f32 to vector<1x1x8xf32>
    %70 = arith.select %67, %68, %69 : vector<1x1x8xi1>, vector<1x1x8xf32>
    %71 = arith.addf %65, %70 : vector<1x1x8xf32>
    %c2_i32 = arith.constant 2 : i32
    %72 = vector.broadcast %c2_i32 : i32 to vector<1x1x8xi32>
    %73 = arith.cmpi eq, %58, %72 : vector<1x1x8xi32>
    %cst_25 = arith.constant 0.000000e+00 : f32
    %74 = vector.broadcast %25 : f32 to vector<1x1x8xf32>
    %75 = vector.broadcast %cst_25 : f32 to vector<1x1x8xf32>
    %76 = arith.select %73, %74, %75 : vector<1x1x8xi1>, vector<1x1x8xf32>
    %77 = arith.addf %71, %76 : vector<1x1x8xf32>
    %c3_i32 = arith.constant 3 : i32
    %78 = vector.broadcast %c3_i32 : i32 to vector<1x1x8xi32>
    %79 = arith.cmpi eq, %58, %78 : vector<1x1x8xi32>
    %cst_26 = arith.constant 0.000000e+00 : f32
    %80 = vector.broadcast %31 : f32 to vector<1x1x8xf32>
    %81 = vector.broadcast %cst_26 : f32 to vector<1x1x8xf32>
    %82 = arith.select %79, %80, %81 : vector<1x1x8xi1>, vector<1x1x8xf32>
    %83 = arith.addf %77, %82 : vector<1x1x8xf32>
    %c4_i32 = arith.constant 4 : i32
    %84 = vector.broadcast %c4_i32 : i32 to vector<1x1x8xi32>
    %85 = arith.cmpi eq, %58, %84 : vector<1x1x8xi32>
    %cst_27 = arith.constant 0.000000e+00 : f32
    %86 = vector.broadcast %39 : f32 to vector<1x1x8xf32>
    %87 = vector.broadcast %cst_27 : f32 to vector<1x1x8xf32>
    %88 = arith.select %85, %86, %87 : vector<1x1x8xi1>, vector<1x1x8xf32>
    %89 = arith.addf %83, %88 : vector<1x1x8xf32>
    %c5_i32 = arith.constant 5 : i32
    %90 = vector.broadcast %c5_i32 : i32 to vector<1x1x8xi32>
    %91 = arith.cmpi eq, %58, %90 : vector<1x1x8xi32>
    %cst_28 = arith.constant 0.000000e+00 : f32
    %92 = vector.broadcast %45 : f32 to vector<1x1x8xf32>
    %93 = vector.broadcast %cst_28 : f32 to vector<1x1x8xf32>
    %94 = arith.select %91, %92, %93 : vector<1x1x8xi1>, vector<1x1x8xf32>
    %95 = arith.addf %89, %94 : vector<1x1x8xf32>
    %c6_i32 = arith.constant 6 : i32
    %96 = vector.broadcast %c6_i32 : i32 to vector<1x1x8xi32>
    %97 = arith.cmpi eq, %58, %96 : vector<1x1x8xi32>
    %cst_29 = arith.constant 0.000000e+00 : f32
    %98 = vector.broadcast %51 : f32 to vector<1x1x8xf32>
    %99 = vector.broadcast %cst_29 : f32 to vector<1x1x8xf32>
    %100 = arith.select %97, %98, %99 : vector<1x1x8xi1>, vector<1x1x8xf32>
    %101 = arith.addf %95, %100 : vector<1x1x8xf32>
    %c7_i32 = arith.constant 7 : i32
    %102 = vector.broadcast %c7_i32 : i32 to vector<1x1x8xi32>
    %103 = arith.cmpi eq, %58, %102 : vector<1x1x8xi32>
    %cst_30 = arith.constant 0.000000e+00 : f32
    %104 = vector.broadcast %57 : f32 to vector<1x1x8xf32>
    %105 = vector.broadcast %cst_30 : f32 to vector<1x1x8xf32>
    %106 = arith.select %103, %104, %105 : vector<1x1x8xi1>, vector<1x1x8xf32>
    %107 = arith.addf %101, %106 : vector<1x1x8xf32>
    %c0_31 = arith.constant 0 : index
    %c0_32 = arith.constant 0 : index
    %c0_33 = arith.constant 0 : index
    %108 = vector.load %arg7[%c0_31, %c0_32, %c0_33] : memref<1x1x8xf32, #tpu.memory_space<vmem>>, vector<1x1x8xf32>
    %109 = arith.addf %108, %107 : vector<1x1x8xf32>
    %c0_34 = arith.constant 0 : index
    %c0_35 = arith.constant 0 : index
    %c0_36 = arith.constant 0 : index
    %110 = vector.load %arg7[%c0_34, %c0_35, %c0_36] : memref<1x1x8xf32, #tpu.memory_space<vmem>>, vector<1x1x8xf32>
    tpu.vector_store %arg7[%c0_34, %c0_35, %c0_36], %109 {strides = array<i32>} : memref<1x1x8xf32, #tpu.memory_space<vmem>>, vector<1x1x8xf32>,
    return
  }
  func.func @transform_0(%arg0: i32, %arg1: i32) -> (i32, i32) {
    %c0_i32 = arith.constant 0 : i32
    %c0_i32_0 = arith.constant 0 : i32
    %c0_i32_1 = arith.constant 0 : i32
    return %c0_i32, %c0_i32_0 : i32, i32
  }
  func.func @transform_1(%arg0: i32, %arg1: i32) -> (i32, i32) {
    %c0_i32 = arith.constant 0 : i32
    %c0_i32_0 = arith.constant 0 : i32
    %c0_i32_1 = arith.constant 0 : i32
    return %c0_i32, %c0_i32_0 : i32, i32
  }
  func.func @transform_2(%arg0: i32, %arg1: i32) -> (i32, i32) {
    %c1_i32 = arith.constant 1 : i32
    %0 = arith.muli %arg0, %c1_i32 : i32
    %1 = arith.addi %0, %arg1 : i32
    %c0_i32 = arith.constant 0 : i32
    %c0_i32_0 = arith.constant 0 : i32
    return %1, %c0_i32 : i32, i32
  }
  func.func @transform_3(%arg0: i32, %arg1: i32) -> (i32, i32, i32) {
    %c1_i32 = arith.constant 1 : i32
    %0 = arith.muli %arg0, %c1_i32 : i32
    %1 = arith.addi %0, %arg1 : i32
    %c0_i32 = arith.constant 0 : i32
    %c0_i32_0 = arith.constant 0 : i32
    %c0_i32_1 = arith.constant 0 : i32
    return %c0_i32, %1, %c0_i32_0 : i32, i32, i32
  }
  func.func @transform_4(%arg0: i32, %arg1: i32) -> (i32, i32, i32) {
    %c1_i32 = arith.constant 1 : i32
    %0 = arith.muli %arg0, %c1_i32 : i32
    %1 = arith.addi %0, %arg1 : i32
    %c0_i32 = arith.constant 0 : i32
    %c0_i32_0 = arith.constant 0 : i32
    %c0_i32_1 = arith.constant 0 : i32
    return %c0_i32, %1, %c0_i32_0 : i32, i32, i32
  }
  func.func @transform_5(%arg0: i32, %arg1: i32) -> (i32, i32, i32) {
    %c0_i32 = arith.constant 0 : i32
    %c0_i32_0 = arith.constant 0 : i32
    %c0_i32_1 = arith.constant 0 : i32
    return %arg0, %c0_i32, %c0_i32_0 : i32, i32, i32
  }
}

module attributes {stable_mosaic.version = 11 : i64} {
  func.func @_width_height_kernel(%arg0: i32, %arg1: i32, %arg2: memref<16x16xbf16, #tpu.memory_space<vmem>>, %arg3: memref<16x16xbf16, #tpu.memory_space<vmem>>, %arg4: memref<1x8x16x16xf32, #tpu.memory_space<vmem>>, %arg5: memref<1x8x16x16xbf16, #tpu.memory_space<vmem>>) attributes {dimension_semantics = [#tpu.dimension_semantics<parallel>, #tpu.dimension_semantics<parallel>], iteration_bounds = array<i64: 2, 1>, scalar_prefetch = 0 : i64, scratch_operands = 0 : i64, tpu.core_type = #tpu.core_type<tc>, window_params = [{pipeline_mode = #tpu.pipeline_mode<synchronous>, transform_indices = @transform_0, window_bounds = array<i64: 16, 16>}, {pipeline_mode = #tpu.pipeline_mode<synchronous>, transform_indices = @transform_1, window_bounds = array<i64: 16, 16>}, {transform_indices = @transform_2, window_bounds = array<i64: 1, 8, 16, 16>}, {transform_indices = @transform_3, window_bounds = array<i64: 1, 8, 16, 16>}]} {
    %c0 = arith.constant 0 : index
    %c0_0 = arith.constant 0 : index
    %c0_1 = arith.constant 0 : index
    %c0_2 = arith.constant 0 : index
    %0 = vector.load %arg4[%c0, %c0_0, %c0_1, %c0_2] : memref<1x8x16x16xf32, #tpu.memory_space<vmem>>, vector<1x8x16x16xf32>
    %1 = vector.shape_cast %0 : vector<1x8x16x16xf32> to vector<8x16x16xf32>
    %2 = vector.shape_cast %1 : vector<8x16x16xf32> to vector<128x16xf32>
    %3 = arith.truncf %2 : vector<128x16xf32> to vector<128x16xbf16>
    %c0_3 = arith.constant 0 : index
    %c0_4 = arith.constant 0 : index
    %4 = vector.load %arg2[%c0_3, %c0_4] : memref<16x16xbf16, #tpu.memory_space<vmem>>, vector<16x16xbf16>
    %cst = arith.constant dense<0.000000e+00> : vector<128x16xf32>
    %5 = tpu.matmul %3, %4, %cst {dimension_numbers = #tpu.dot_dimension_numbers<[1], [0], [0], [1], [0, 0, 1, 1], [], []>} : vector<128x16xbf16>, vector<16x16xbf16>, vector<128x16xf32> -> vector<128x16xf32>
    %6 = vector.shape_cast %5 : vector<128x16xf32> to vector<8x16x16xf32>
    %c0_5 = arith.constant 0 : index
    %c0_6 = arith.constant 0 : index
    %7 = vector.load %arg3[%c0_5, %c0_6] : memref<16x16xbf16, #tpu.memory_space<vmem>>, vector<16x16xbf16>
    %8 = vector.shape_cast %7 : vector<16x16xbf16> to vector<1x16x16xbf16>
    %9 = vector.shape_cast %8 : vector<1x16x16xbf16> to vector<1x16x16xbf16>
    %10 = vector.broadcast %9 : vector<1x16x16xbf16> to vector<8x16x16xbf16>
    %11 = arith.truncf %6 : vector<8x16x16xf32> to vector<8x16x16xbf16>
    "tpu.trace_start"() <{level = 10 : i32, message = "duh,dhw->duw"}> : () -> ()
    %cst_7 = arith.constant dense<0.000000e+00> : vector<8x16x16xf32>
    %12 = tpu.matmul %10, %11, %cst_7 {dimension_numbers = #tpu.dot_dimension_numbers<[2], [1], [1], [2], [0, 0, 0, 1, 1, 2], [0], [0]>} : vector<8x16x16xbf16>, vector<8x16x16xbf16>, vector<8x16x16xf32> -> vector<8x16x16xf32>
    "tpu.trace_stop"() : () -> ()
    %13 = arith.truncf %12 : vector<8x16x16xf32> to vector<8x16x16xbf16>
    %c0_8 = arith.constant 0 : index
    %c0_9 = arith.constant 0 : index
    %c0_10 = arith.constant 0 : index
    %c0_11 = arith.constant 0 : index
    %14 = vector.load %arg5[%c0_8, %c0_9, %c0_10, %c0_11] : memref<1x8x16x16xbf16, #tpu.memory_space<vmem>>, vector<1x8x16x16xbf16>
    %15 = vector.shape_cast %14 : vector<1x8x16x16xbf16> to vector<8x16x16xbf16>
    %16 = vector.shape_cast %13 : vector<8x16x16xbf16> to vector<1x8x16x16xbf16>
    tpu.vector_store %arg5[%c0_8, %c0_9, %c0_10, %c0_11], %16 {strides = array<i32>} : memref<1x8x16x16xbf16, #tpu.memory_space<vmem>>, vector<1x8x16x16xbf16>,
    return
  }
  func.func @transform_0(%arg0: i32, %arg1: i32) -> (i32, i32) {
    %c0_i32 = arith.constant 0 : i32
    %c0_i32_0 = arith.constant 0 : i32
    %c0_i32_1 = arith.constant 0 : i32
    return %c0_i32, %c0_i32_0 : i32, i32
  }
  func.func @transform_1(%arg0: i32, %arg1: i32) -> (i32, i32) {
    %c0_i32 = arith.constant 0 : i32
    %c0_i32_0 = arith.constant 0 : i32
    %c0_i32_1 = arith.constant 0 : i32
    return %c0_i32, %c0_i32_0 : i32, i32
  }
  func.func @transform_2(%arg0: i32, %arg1: i32) -> (i32, i32, i32, i32) {
    %c0_i32 = arith.constant 0 : i32
    %c0_i32_0 = arith.constant 0 : i32
    %c0_i32_1 = arith.constant 0 : i32
    return %arg0, %arg1, %c0_i32, %c0_i32_0 : i32, i32, i32, i32
  }
  func.func @transform_3(%arg0: i32, %arg1: i32) -> (i32, i32, i32, i32) {
    %c0_i32 = arith.constant 0 : i32
    %c0_i32_0 = arith.constant 0 : i32
    %c0_i32_1 = arith.constant 0 : i32
    return %arg0, %arg1, %c0_i32, %c0_i32_0 : i32, i32, i32, i32
  }
}

module attributes {stable_mosaic.version = 11 : i64} {
  func.func @_depth_kernel(%arg0: i32, %arg1: i32, %arg2: memref<8x8xbf16, #tpu.memory_space<vmem>>, %arg3: memref<1x8x256xbf16, #tpu.memory_space<vmem>>, %arg4: memref<1x8x256xf32, #tpu.memory_space<vmem>>) attributes {dimension_semantics = [#tpu.dimension_semantics<parallel>, #tpu.dimension_semantics<parallel>], iteration_bounds = array<i64: 2, 1>, scalar_prefetch = 0 : i64, scratch_operands = 0 : i64, tpu.core_type = #tpu.core_type<tc>, window_params = [{pipeline_mode = #tpu.pipeline_mode<synchronous>, transform_indices = @transform_0, window_bounds = array<i64: 8, 8>}, {transform_indices = @transform_1, window_bounds = array<i64: 1, 8, 256>}, {transform_indices = @transform_2, window_bounds = array<i64: 1, 8, 256>}]} {
    %c0 = arith.constant 0 : index
    %c0_0 = arith.constant 0 : index
    %0 = vector.load %arg2[%c0, %c0_0] : memref<8x8xbf16, #tpu.memory_space<vmem>>, vector<8x8xbf16>
    %c0_1 = arith.constant 0 : index
    %c0_2 = arith.constant 0 : index
    %c0_3 = arith.constant 0 : index
    %1 = vector.load %arg3[%c0_1, %c0_2, %c0_3] : memref<1x8x256xbf16, #tpu.memory_space<vmem>>, vector<1x8x256xbf16>
    %2 = vector.shape_cast %1 : vector<1x8x256xbf16> to vector<8x256xbf16>
    %cst = arith.constant dense<0.000000e+00> : vector<8x256xf32>
    %3 = tpu.matmul %0, %2, %cst {dimension_numbers = #tpu.dot_dimension_numbers<[1], [0], [0], [1], [0, 0, 1, 1], [], []>} : vector<8x8xbf16>, vector<8x256xbf16>, vector<8x256xf32> -> vector<8x256xf32>
    %c0_4 = arith.constant 0 : index
    %c0_5 = arith.constant 0 : index
    %c0_6 = arith.constant 0 : index
    %4 = vector.load %arg4[%c0_4, %c0_5, %c0_6] : memref<1x8x256xf32, #tpu.memory_space<vmem>>, vector<1x8x256xf32>
    %5 = vector.shape_cast %4 : vector<1x8x256xf32> to vector<8x256xf32>
    %6 = vector.shape_cast %3 : vector<8x256xf32> to vector<1x8x256xf32>
    tpu.vector_store %arg4[%c0_4, %c0_5, %c0_6], %6 {strides = array<i32>} : memref<1x8x256xf32, #tpu.memory_space<vmem>>, vector<1x8x256xf32>,
    return
  }
  func.func @transform_0(%arg0: i32, %arg1: i32) -> (i32, i32) {
    %c0_i32 = arith.constant 0 : i32
    %c0_i32_0 = arith.constant 0 : i32
    %c0_i32_1 = arith.constant 0 : i32
    return %c0_i32, %c0_i32_0 : i32, i32
  }
  func.func @transform_1(%arg0: i32, %arg1: i32) -> (i32, i32, i32) {
    %c0_i32 = arith.constant 0 : i32
    %c0_i32_0 = arith.constant 0 : i32
    return %arg0, %c0_i32, %arg1 : i32, i32, i32
  }
  func.func @transform_2(%arg0: i32, %arg1: i32) -> (i32, i32, i32) {
    %c0_i32 = arith.constant 0 : i32
    %c0_i32_0 = arith.constant 0 : i32
    return %arg0, %c0_i32, %arg1 : i32, i32, i32
  }
}

</mosaic_0001>

<bundles_post_ra>
// kernel: tile.8
= control target key start
LH: loop header
LB: loop body
LE: loop exit
PB: predicated region body
PF: predicated region fallthrough
CT: control target
= control target key end

     0   :  { %s28_s0 = inlined_call_operand.vmem [shape: f32[16], index: 0, kind: input, shape index: {}]   ;;  %s29_s1 = inlined_call_operand.vmem [shape: f32[16,16], index: 1, kind: output, shape index: {}]  }
   0x1   :  { %v4_v0 = vld [vmem:[%s28_s0] ss:$0 sm:$0xff] }
   0x2   :  { %5 = vst [vmem:[%s29_s1] sm:$0xff] %v4_v0  ;;  %8 = vst [vmem:[%s29_s1 + $0x8] sm:$0xff] %v4_v0 }

// kernel: center_of_mass_initial_pairwise.3
= control target key start
LH: loop header
LB: loop body
LE: loop exit
PB: predicated region body
PF: predicated region fallthrough
CT: control target
= control target key end

     0   :  { %v103_v0 = vlaneseq  ;;  %v296_v1 = vmov 0   ;;  %vm81_vm0 = vcmask 57344   ;;  %s374_s2 = inlined_call_operand.vmem [shape: f32[8,1], index: 2, kind: input, shape index: {}]   ;;  %s375_s4 = inlined_call_operand.vmem [shape: f32[2,8,256], index: 4, kind: input, shape index: {}]   ;;  %s376_s0 = inlined_call_operand.vmem [shape: f32[1,256], index: 0, kind: input, shape index: {}]   ;;  %s377_s1 = inlined_call_operand.vmem [shape: f32[1,256], index: 1, kind: input, shape index: {}]   ;;  %s378_s3 = inlined_call_operand.vmem [shape: f32[2,8,256], index: 3, kind: input, shape index: {}]   ;;  %s379_s5 = inlined_call_operand.vmem [shape: f32[1,1,8], index: 5, kind: output, shape index: {}]  }
   0x1   :  { %295 = vset.pattern.permute.xlu0 %v296_v1  ;;  %v85_v2 = vld [vmem:[%s374_s2] sm:$0xff]  ;;  %v166_v4 = vld [vmem:[%s375_s4 + $0x8] sm:$0xff]  ;;  %v167_v5 = vld [vmem:[%s375_s4 + $0x10] sm:$0xff] }
   0x2   :  { %v165_v3 = vld [vmem:[%s375_s4] sm:$0xff]  ;;  %150 = vperm.xlu0 %295, %v85_v2   ;;  %v168_v6 = vld [vmem:[%s375_s4 + $0x18] sm:$0xff]  ;;  %v104_v7 = vshrl.u32 %v103_v0, 7  ;;  %v87_v16 = vld [vmem:[%s378_s3 + $0x8] sm:$0xff] }
   0x3   :  { %v169_v8 = vadd.f32 %v167_v5, %v165_v3  ;;  %v170_v9 = vadd.f32 %v168_v6, %v166_v4  ;;  %v83_v10 = vld [vmem:[%s376_s0] sm:$0x3]  ;;  %v88_v33 = vld [vmem:[%s378_s3 + $0x10] sm:$0xff]  ;;  %v89_v34 = vld [vmem:[%s378_s3 + $0x18] sm:$0xff] }
   0x4   :  { %v105_v11 = vsub.s32 0, %v104_v7  ;;  %v109_v12 = vsub.s32 1, %v104_v7  ;;  %v84_v13 = vld [vmem:[%s377_s1] sm:$0x3]  ;;  %v91_v36 = vadd.f32 %v89_v34, %v87_v16 }
   0x5   :  { %v171_v14 = vadd.f32 %v170_v9, %v169_v8  ;;  %v86_v15 = vld [vmem:[%s378_s3] sm:$0xff] }
   0x6   :  { %v106_v17 = vrot.slane %v83_v10, %v105_v11  ;;  %v110_v18 = vrot.slane %v83_v10, %v109_v12  ;;  %v129_v19 = vrot.slane %v84_v13, %v105_v11  ;;  %v133_v20 = vrot.slane %v84_v13, %v109_v12 }
   0x7   :  { %172 = vadd.xlane.f32.xlu1 %v171_v14  ;;  %v90_v35 = vadd.f32 %v88_v33, %v86_v15 }
   0x8   :  { %v113_v21 = vmul.f32 %v106_v17, %v86_v15  ;;  %v114_v22 = vmul.f32 %v110_v18, %v87_v16  ;;  %v136_v23 = vmul.f32 %v129_v19, %v86_v15  ;;  %v137_v24 = vmul.f32 %v133_v20, %v87_v16 }
   0x9   :  { %v193_v25 = vmul.f32 %v165_v3, %v129_v19  ;;  %v194_v26 = vmul.f32 %v166_v4, %v133_v20  ;;  %v181_v30 = vmul.f32 %v165_v3, %v106_v17  ;;  %v182_v31 = vmul.f32 %v166_v4, %v110_v18 }
   0xa   :  { %v115_v27 = vadd.f32 %v114_v22, %v113_v21  ;;  %v138_v29 = vadd.f32 %v137_v24, %v136_v23  ;;  %v92_v37 = vadd.f32 %v91_v36, %v90_v35 }
   0xb   :  { %v195_v28 = vadd.f32 %v194_v26, %v193_v25  ;;  %v183_v32 = vadd.f32 %v182_v31, %v181_v30 }
   0xc   :  { %116 = vadd.xlane.f32.xlu1 %v115_v27 }
  0x10   :  { %139 = vadd.xlane.f32.xlu1 %v138_v29 }
  0x14   :  { %184 = vadd.xlane.f32.xlu1 %v183_v32 }
  0x21   :  { %93 = vadd.xlane.f32.xlu0 %v92_v37 }
  0x7d   :  { %v151_v38 = vpop.permute.xlu0 %150 }
  0x7e   :  { %v153_v39 = vmul.f32 %v151_v38, %v86_v15  ;;  %v154_v40 = vmul.f32 %v151_v38, %v87_v16  ;;  %v205_v42 = vmul.f32 %v165_v3, %v151_v38  ;;  %v206_v43 = vmul.f32 %v166_v4, %v151_v38 }
  0x7f   :  { %v297_v4 = vmov 0.0  }
  0x80   :  { %v155_v41 = vadd.f32 %v154_v40, %v153_v39  ;;  %v207_v44 = vadd.f32 %v206_v43, %v205_v42  ;;  %82 = vst.msk [vmem:[%s379_s5] sm:$0x1] %vm81_vm0, %v297_v4  ;;  %v218_v39 = vand.u32 127, %v103_v0 }
  0x82   :  { %156 = vadd.xlane.f32.xlu1 %v155_v41  ;;  %vm219_vm1 = vcmp.eq.s32.totalorder %v218_v39, 0  ;;  %vm223_vm2 = vcmp.eq.s32.totalorder %v218_v39, 1  ;;  %vm227_vm3 = vcmp.eq.s32.totalorder %v218_v39, 2  ;;  %vm231_vm4 = vcmp.eq.s32.totalorder %v218_v39, 3 }
  0x83   :  { %vm235_vm5 = vcmp.eq.s32.totalorder %v218_v39, 4  ;;  %vm239_vm6 = vcmp.eq.s32.totalorder %v218_v39, 5  ;;  %vm243_vm7 = vcmp.eq.s32.totalorder %v218_v39, 6  ;;  %vm247_vm8 = vcmp.eq.s32.totalorder %v218_v39, 7 }
  0x86   :  { %196 = vadd.xlane.f32.xlu1 %v195_v28 }
  0x8a   :  { %208 = vadd.xlane.f32.xlu1 %v207_v44 }
  0x90   :  { %v173_v45 = vpop.xlane.xlu1 %172 }
  0x91   :  { %v174_v6 = vrot.slane %v173_v45, 4 }
  0x93   :  { %v175_v8 = vadd.f32 %v174_v6, %v173_v45 }
  0x95   :  { %v117_v46 = vpop.xlane.xlu1 %116  ;;  %v176_v10 = vrot.slane %v175_v8, 2 }
  0x96   :  { %v118_v48 = vrot.slane %v117_v46, 4 }
  0x97   :  { %v177_v16 = vadd.f32 %v176_v10, %v175_v8 }
  0x98   :  { %v119_v50 = vadd.f32 %v118_v48, %v117_v46 }
  0x99   :  { %v140_v47 = vpop.xlane.xlu1 %139  ;;  %v178_v23 = vrot.slane %v177_v16, 1 }
  0x9a   :  { %v141_v49 = vrot.slane %v140_v47, 4  ;;  %v120_v52 = vrot.slane %v119_v50, 2 }
  0x9b   :  { %v179_v31 = vadd.f32 %v178_v23, %v177_v16 }
  0x9c   :  { %v142_v51 = vadd.f32 %v141_v49, %v140_v47  ;;  %v121_v56 = vadd.f32 %v120_v52, %v119_v50 }
  0x9d   :  { %v185_v5 = vpop.xlane.xlu1 %184 }
  0x9e   :  { %v143_v53 = vrot.slane %v142_v51, 2  ;;  %v122_v60 = vrot.slane %v121_v56, 1  ;;  %v186_v7 = vrot.slane %v185_v5, 4 }
  0xa0   :  { %v144_v58 = vadd.f32 %v143_v53, %v142_v51  ;;  %v123_v1 = vadd.f32 %v122_v60, %v121_v56  ;;  %v187_v9 = vadd.f32 %v186_v7, %v185_v5 }
  0xa2   :  { %v145_v62 = vrot.slane %v144_v58, 1  ;;  %v188_v12 = vrot.slane %v187_v9, 2 }
  0xa4   :  { %v146_v3 = vadd.f32 %v145_v62, %v144_v58  ;;  %v189_v19 = vadd.f32 %v188_v12, %v187_v9 }
  0xa6   :  { %v190_v27 = vrot.slane %v189_v19, 1 }
  0xa8   :  { %v191_v33 = vadd.f32 %v190_v27, %v189_v19 }
  0xaa   :  { %v94_v54 = vpop.xlane.xlu0 %93 }
  0xab   :  { %v95_v55 = vrot.slane %v94_v54, 4 }
  0xad   :  { %v96_v57 = vadd.f32 %v95_v55, %v94_v54 }
  0xaf   :  { %v97_v59 = vrot.slane %v96_v57, 2 }
  0xb1   :  { %v98_v61 = vadd.f32 %v97_v59, %v96_v57 }
  0xb3   :  { %v99_v63 = vrot.slane %v98_v61, 1 }
  0xb5   :  { %v100_v2 = vadd.f32 %v99_v63, %v98_v61  ;;  %v251_v61 = vld [vmem:[%s379_s5] sm:$0x1] }
  0xb7   :  { %277 = vpush %v100_v2 }
  0xb8   :  { %279 = vpush %v123_v1 }
  0xb9   :  { %281 = vpush %v146_v3 }
  0xe8   :  { %s278_s12 = spop %277 }
  0xe9   :  { %s280_s13 = spop %279  ;;  %v220_v40 = vstv %s278_s12 }
  0xea   :  { %v224_v41 = vstv %s280_s13  ;;  %s282_s14 = spop %281  ;;  %v221_v42 = vsel %vm219_vm1, %v220_v40, 0.0 }
  0xeb   :  { %v225_v43 = vsel %vm223_vm2, %v224_v41, 0.0  ;;  %v228_v44 = vstv %s282_s14 }
  0xec   :  { %v226_v45 = vadd.f32 %v225_v43, %v221_v42  ;;  %v229_v46 = vsel %vm227_vm3, %v228_v44, 0.0 }
  0xee   :  { %v230_v47 = vadd.f32 %v229_v46, %v226_v45 }
 0x10b   :  { %v157_v11 = vpop.xlane.xlu1 %156 }
 0x10c   :  { %v158_v13 = vrot.slane %v157_v11, 4 }
 0x10e   :  { %v159_v14 = vadd.f32 %v158_v13, %v157_v11 }
 0x10f   :  { %v197_v15 = vpop.xlane.xlu1 %196 }
 0x110   :  { %v160_v17 = vrot.slane %v159_v14, 2  ;;  %v198_v18 = vrot.slane %v197_v15, 4 }
 0x112   :  { %v199_v20 = vadd.f32 %v198_v18, %v197_v15  ;;  %v161_v21 = vadd.f32 %v160_v17, %v159_v14 }
 0x113   :  { %v209_v22 = vpop.xlane.xlu1 %208 }
 0x114   :  { %v200_v24 = vrot.slane %v199_v20, 2  ;;  %v210_v25 = vrot.slane %v209_v22, 4  ;;  %v162_v26 = vrot.slane %v161_v21, 1 }
 0x116   :  { %v211_v28 = vadd.f32 %v210_v25, %v209_v22  ;;  %v163_v29 = vadd.f32 %v162_v26, %v161_v21  ;;  %v201_v30 = vadd.f32 %v200_v24, %v199_v20 }
 0x118   :  { %v212_v32 = vrot.slane %v211_v28, 2  ;;  %283 = vpush %v163_v29  ;;  %v202_v34 = vrot.slane %v201_v30, 1 }
 0x119   :  { %285 = vpush %v179_v31 }
 0x11a   :  { %v213_v35 = vadd.f32 %v212_v32, %v211_v28  ;;  %287 = vpush %v191_v33  ;;  %v203_v36 = vadd.f32 %v202_v34, %v201_v30 }
 0x11c   :  { %289 = vpush %v203_v36  ;;  %v214_v37 = vrot.slane %v213_v35, 1 }
 0x11e   :  { %v215_v38 = vadd.f32 %v214_v37, %v213_v35 }
 0x120   :  { %291 = vpush %v215_v38 }
 0x149   :  { %s284_s15 = spop %283 }
 0x14a   :  { %v232_v48 = vstv %s284_s15  ;;  %s286_s16 = spop %285 }
 0x14b   :  { %v233_v49 = vsel %vm231_vm4, %v232_v48, 0.0  ;;  %v236_v0 = vstv %s286_s16  ;;  %s288_s17 = spop %287 }
 0x14c   :  { %v234_v50 = vadd.f32 %v233_v49, %v230_v47  ;;  %v240_v51 = vstv %s288_s17  ;;  %v237_v52 = vsel %vm235_vm5, %v236_v0, 0.0 }
 0x14d   :  { %s290_s18 = spop %289  ;;  %v241_v55 = vsel %vm239_vm6, %v240_v51, 0.0 }
 0x14e   :  { %v238_v53 = vadd.f32 %v237_v52, %v234_v50  ;;  %v244_v54 = vstv %s290_s18 }
 0x14f   :  { %v245_v57 = vsel %vm243_vm7, %v244_v54, 0.0 }
 0x150   :  { %v242_v56 = vadd.f32 %v241_v55, %v238_v53 }
 0x151   :  { %s292_s19 = spop %291 }
 0x152   :  { %v246_v58 = vadd.f32 %v245_v57, %v242_v56  ;;  %v248_v59 = vstv %s292_s19 }
 0x153   :  { %v249_v60 = vsel %vm247_vm8, %v248_v59, 0.0 }
 0x154   :  { %v250_v62 = vadd.f32 %v249_v60, %v246_v58 }
 0x156   :  { %v252_v63 = vadd.f32 %v251_v61, %v250_v62 }
 0x158   :  { %254 = vst.msk [vmem:[%s379_s5] sm:$0x1] %vm81_vm0, %v252_v63 }

// kernel: center_of_mass_initial_pairwise.5
= control target key start
LH: loop header
LB: loop body
LE: loop exit
PB: predicated region body
PF: predicated region fallthrough
CT: control target
= control target key end

     0   :  { %s416_s9 = smov 0   ;;  %s418_s10 = smov 0   ;;  %s452_s0 = inlined_call_operand.vmem [shape: bf16[8,8], index: 0, kind: input, shape index: {}]   ;;  %s453_s1 = inlined_call_operand.vmem [shape: bf16[2,8,256], index: 1, kind: input, shape index: {}]   ;;  %s454_s2 = inlined_call_operand.vmem [shape: f32[2,8,256], index: 2, kind: output, shape index: {}]  }
   0x1   :  { %s420_s11 = smov 0  }
   0x2 LB: > { %s24_s12 = sadd.s32 1, %s394_s10  ;;  %p336_p0 = scmp.ge.s32.totalorder %s398_s11, 1  ;;  %s398_s11 = sphi %s420_s11, %s12_s11   ;;  %s394_s10 = sphi %s418_s10, %s456_s10   ;;  %s390_s9 = sphi %s416_s9, %s455_s9  }
   0x3   : > { %p26_p1 = scmp.ge.s32.totalorder %s24_s12, 2  ;;  %p133_p2 = scmp.lt.s32.totalorder %s398_s11, 3 }
   0x5   : > { %s458_s12 = smov (%p26_p1, %s24_s12), 0  ;;  %p134_p3 = pnand %p336_p0, %p133_p2 }
   0x6   : > { %p164_p4 = scmp.lt.s32.totalorder (!%p134_p3), %s390_s9, 1 }
   0x7   : > { %137 = sbr.rel (%p134_p3) target bundleno = 221 (0xdd), region = 28 }
   0xc   : > { %v400_v0 = vmov 0   ;;  %s460_s9 = smov (!%p164_p4, %s390_s9), 1  ;;  %vm195_vm0 = vcmask 1043456   ;;  %v184_v5 = vld [vmem:[%s452_s0] sm:$0xf]  ;;  %vm191_vm1 = vcmask 64512  }
   0xd   : > { %234 = vmatprep.mubr.bf16.mxu0 %v400_v0  ;;  %s347_s13 = sshll.u32 %s460_s9, 3  ;;  %s348_s19 = sshll.u32 %s460_s9, 4 }
   0xe   : > { %s171_s16 = scalar_lea.vmem %s453_s1, %s347_s13  ;;  %s181_s22 = scalar_lea.vmem %s454_s2, %s348_s19 }
   0xf   : > { %v185_v1 = vld [vmem:[%s171_s16] sm:$0xff] }
  0x10   : > { %v342_v2 = vcombine.high %v185_v1, %v185_v1  ;;  %v341_v3 = vcombine.low %v185_v1, %v185_v1 }
  0x12   : > { %343 = vmatprep.subr.msk.bf16.mxu0 %vm195_vm0, %v342_v2  ;;  %v197_v4 = vsel %vm195_vm0, %v341_v3, 0 }
  0x13   : > { %217 = vmatpush1.bf16.msra.mxu0 %v197_v4 }
  0x16   : > { %344 = vmatmul.mubr.msk.bf16.vlgmr.msra.gmra.mxu0 %vm191_vm1, %v184_v5 }
  0xd6   : > { %v236_v6 = vpop.f32.mrf.mxu0 }
  0xd7   : > { %243 = vst [vmem:[%s181_s22] sm:$0xff] %v236_v6 }
  0xd8   : > { %v238_v7 = vpop.f32.mrf.mxu0 }
  0xd9   : > { %244 = vst [vmem:[%s181_s22 + $0x8] sm:$0xff] %v238_v7 }
  0xda   : > { %v240_v8 = vpop.f32.mrf.mxu0 }
  0xdc   : > { %v241_v9 = vpop.f32.mrf.mxu0 }
  0xdd PF: > { %s12_s11 = sadd.s32 1, %s398_s11   ;;  %s455_s9 = smov %s394_s10 }
  0xde   : > { %p9_p5 = scmp.ge.s32.totalorder %s12_s11, 4   ;;  %s456_s10 = smov %s458_s12 }
  0xe0   :  { %11 = sbr.rel (!%p9_p5) target bundleno = 2 (0x2), region = 58 }

// kernel: center_of_mass_initial_pairwise.4
= control target key start
LH: loop header
LB: loop body
LE: loop exit
PB: predicated region body
PF: predicated region fallthrough
CT: control target
= control target key end

     0   :  { %s1121_s12 = smov 0   ;;  %s1123_s13 = smov 0   ;;  %s1240_s0 = inlined_call_operand.vmem [shape: bf16[16,16], index: 0, kind: input, shape index: {}]   ;;  %s1241_s1 = inlined_call_operand.vmem [shape: bf16[16,16], index: 1, kind: input, shape index: {}]   ;;  %s1242_s2 = inlined_call_operand.vmem [shape: f32[2,8,16,16], index: 2, kind: input, shape index: {}]   ;;  %s1243_s3 = inlined_call_operand.vmem [shape: bf16[2,8,16,16], index: 3, kind: output, shape index: {}]  }
   0x1   :  { %s1125_s14 = smov 0  }
   0x2 LB: > { %s25_s15 = sadd.s32 1, %s1093_s13  ;;  %p897_p0 = scmp.ge.s32.totalorder %s1097_s14, 1  ;;  %s1097_s14 = sphi %s1125_s14, %s13_s14   ;;  %s1093_s13 = sphi %s1123_s13, %s1245_s13   ;;  %s1089_s12 = sphi %s1121_s12, %s1244_s12  }
   0x3   : > { %p27_p1 = scmp.ge.s32.totalorder %s25_s15, 2  ;;  %p159_p2 = scmp.lt.s32.totalorder %s1097_s14, 3 }
   0x5   : > { %s1247_s15 = smov (%p27_p1, %s25_s15), 0  ;;  %p160_p3 = pnand %p897_p0, %p159_p2 }
   0x6   : > { %p194_p4 = scmp.lt.s32.totalorder (!%p160_p3), %s1089_s12, 1 }
   0x7   : > { %163 = sbr.rel (%p160_p3) target bundleno = 463 (0x1cf), region = 32 }
   0xc   : > { %v1073_v0 = vld [vmem:[%s1240_s0] sm:$0xff]   ;;  %s1249_s12 = smov (!%p194_p4, %s1089_s12), 1  ;;  %vm248_vm0 = vcmask 130048   ;;  %v1099_v25 = vmov 0.0   ;;  %vm1100_vm1 = vmmov 0   ;;  %vm780_vm2 = vcmask 125952  }
   0xd   : > { %981 = vmatprep.subr.bf16.mxu0 %v1073_v0  ;;  %s938_s18 = sshll.u32 %s1249_s12, 7  ;;  %999 = vmatprep.subr.bf16.mxu1 %v1099_v25  ;;  %v1074_v32 = vld [vmem:[%s1241_s1] sm:$0xff]   ;;  %s939_s24 = sshll.u32 %s1249_s12, 6 }
   0xe   : > { %982 = vmatpush3.bf16.msra.mxu0 %v1073_v0  ;;  %s1148_s21 = scalar_lea.vmem %s1242_s2, %s938_s18  ;;  %1001 = vmatprep.mubr.msk.bf16.mxu1 %vm1100_vm1, %v1099_v25  ;;  %s1197_s27 = scalar_lea.vmem %s1243_s3, %s939_s24 }
   0xf   : > { %v216_v1 = vld [vmem:[%s1148_s21] sm:$0xff]  ;;  %v217_v2 = vld [vmem:[%s1148_s21 + $0x8] sm:$0xff]  ;;  %v218_v3 = vld [vmem:[%s1148_s21 + $0x10] sm:$0xff]  ;;  %1023 = vmatprep.subr.bf16.mxu0 %v1099_v25 }
  0x10   : > { %v232_v4 = vpack.c.bf16 %v217_v2, %v216_v1  ;;  %v219_v5 = vld [vmem:[%s1148_s21 + $0x18] sm:$0xff]  ;;  %v220_v6 = vld [vmem:[%s1148_s21 + $0x20] sm:$0xff]  ;;  %v221_v7 = vld [vmem:[%s1148_s21 + $0x28] sm:$0xff] }
  0x11   : > { %v233_v8 = vpack.c.bf16 %v219_v5, %v218_v3  ;;  %v234_v9 = vpack.c.bf16 %v221_v7, %v220_v6  ;;  %v222_v10 = vld [vmem:[%s1148_s21 + $0x30] sm:$0xff]  ;;  %v223_v11 = vld [vmem:[%s1148_s21 + $0x38] sm:$0xff]  ;;  %v224_v12 = vld [vmem:[%s1148_s21 + $0x40] sm:$0xff] }
  0x12   : > { %983 = vmatprep.mubr.msk.bf16.mxu0 %vm248_vm0, %v232_v4  ;;  %v225_v13 = vld [vmem:[%s1148_s21 + $0x48] sm:$0xff]  ;;  %v235_v14 = vpack.c.bf16 %v223_v11, %v222_v10  ;;  %v226_v16 = vld [vmem:[%s1148_s21 + $0x50] sm:$0xff]  ;;  %v227_v17 = vld [vmem:[%s1148_s21 + $0x58] sm:$0xff] }
  0x13   : > { %984 = vmatmul.mubr.msk.bf16.vlgmr.msra.gmra.mxu0 %vm248_vm0, %v233_v8  ;;  %v236_v15 = vpack.c.bf16 %v225_v13, %v224_v12  ;;  %v228_v18 = vld [vmem:[%s1148_s21 + $0x60] sm:$0xff]  ;;  %v229_v19 = vld [vmem:[%s1148_s21 + $0x68] sm:$0xff]  ;;  %v237_v20 = vpack.c.bf16 %v227_v17, %v226_v16  ;;  %v230_v22 = vld [vmem:[%s1148_s21 + $0x70] sm:$0xff] }
  0x14   : > { %987 = vmatprep.mubr.msk.bf16.mxu0 %vm248_vm0, %v234_v9  ;;  %v238_v21 = vpack.c.bf16 %v229_v19, %v228_v18  ;;  %v231_v23 = vld [vmem:[%s1148_s21 + $0x78] sm:$0xff] }
  0x15   : > { %v239_v24 = vpack.c.bf16 %v231_v23, %v230_v22 }
  0x1b   : > { %988 = vmatmul.mubr.msk.bf16.gmra.mxu0 %vm248_vm0, %v235_v14 }
  0x1c   : > { %991 = vmatprep.mubr.msk.bf16.mxu0 %vm248_vm0, %v236_v15 }
  0x23   : > { %992 = vmatmul.mubr.msk.bf16.gmra.mxu0 %vm248_vm0, %v237_v20 }
  0x24   : > { %995 = vmatprep.mubr.msk.bf16.mxu0 %vm248_vm0, %v238_v21 }
  0x2b   : > { %996 = vmatmul.mubr.msk.bf16.gmra.mxu0 %vm248_vm0, %v239_v24 }
  0x2c   : > { %1025 = vmatprep.mubr.msk.bf16.mxu0 %vm1100_vm1, %v1099_v25 }
  0xd3   : > { %v985_v26 = vpop.f32.mrf.mxu0 }
  0xd5   : > { %v307_v27 = vpop.f32.mrf.mxu0 }
  0xd7   : > { %v986_v28 = vpop.f32.mrf.mxu0 }
  0xd8   : > { %v373_v34 = vpack.c.bf16 %v986_v28, %v985_v26 }
  0xd9   : > { %v310_v29 = vpop.f32.mrf.mxu0 }
  0xda   : > { %v372_v30 = vpack.c.bf16 %v310_v29, %v307_v27 }
  0xdb   : > { %v989_v31 = vpop.f32.mrf.mxu0 }
  0xdc   : > { %1000 = vmatpush3.bf16.msra.mxu1 %v372_v30 }
  0xdd   : > { %v323_v33 = vpop.f32.mrf.mxu0  ;;  %1005 = vmatprep.subr.bf16.mxu1 %v1099_v25 }
  0xdf   : > { %v990_v35 = vpop.f32.mrf.mxu0  ;;  %1002 = vmatmul.mubr.msk.bf16.vlgmr.msra.gmra.mxu1 %vm248_vm0, %v1074_v32 }
  0xe0   : > { %1006 = vmatpush3.bf16.msra.mxu1 %v373_v34  ;;  %1007 = vmatprep.mubr.msk.bf16.mxu1 %vm1100_vm1, %v1099_v25  ;;  %v375_v45 = vpack.c.bf16 %v990_v35, %v989_v31 }
  0xe1   : > { %v326_v36 = vpop.f32.mrf.mxu0  ;;  %1011 = vmatprep.subr.bf16.mxu1 %v1099_v25 }
  0xe2   : > { %v374_v38 = vpack.c.bf16 %v326_v36, %v323_v33 }
  0xe3   : > { %v993_v37 = vpop.f32.mrf.mxu0 }
  0xe5   : > { %v339_v39 = vpop.f32.mrf.mxu0 }
  0xe7   : > { %v994_v40 = vpop.f32.mrf.mxu0  ;;  %1008 = vmatmul.mubr.msk.bf16.vlgmr.msra.gmra.mxu1 %vm248_vm0, %v1074_v32 }
  0xe8   : > { %1012 = vmatpush3.bf16.msra.mxu1 %v374_v38  ;;  %1013 = vmatprep.mubr.msk.bf16.mxu1 %vm1100_vm1, %v1099_v25  ;;  %v377_v49 = vpack.c.bf16 %v994_v40, %v993_v37 }
  0xe9   : > { %v342_v41 = vpop.f32.mrf.mxu0  ;;  %1017 = vmatprep.subr.bf16.mxu1 %v1099_v25 }
  0xea   : > { %v376_v42 = vpack.c.bf16 %v342_v41, %v339_v39 }
  0xeb   : > { %v997_v43 = vpop.f32.mrf.mxu0 }
  0xec   : > { %1024 = vmatpush3.bf16.msra.mxu0 %v376_v42 }
  0xed   : > { %v355_v44 = vpop.f32.mrf.mxu0  ;;  %1035 = vmatprep.subr.bf16.mxu0 %v1099_v25 }
  0xef   : > { %1014 = vmatmul.mubr.msk.bf16.vlgmr.msra.gmra.mxu1 %vm248_vm0, %v1074_v32  ;;  %v998_v46 = vpop.f32.mrf.mxu0  ;;  %1026 = vmatmul.mubr.msk.bf16.vlgmr.msra.gmra.mxu0 %vm248_vm0, %v1074_v32 }
  0xf0   : > { %1018 = vmatpush3.bf16.msra.mxu1 %v375_v45  ;;  %1019 = vmatprep.mubr.msk.bf16.mxu1 %vm1100_vm1, %v1099_v25  ;;  %v379_v50 = vpack.c.bf16 %v998_v46, %v997_v43 }
  0xf1   : > { %1029 = vmatprep.subr.bf16.mxu1 %v1099_v25  ;;  %v358_v47 = vpop.f32.mrf.mxu0  ;;  %1037 = vmatprep.mubr.msk.bf16.mxu0 %vm1100_vm1, %v1099_v25 }
  0xf2   : > { %v378_v48 = vpack.c.bf16 %v358_v47, %v355_v44 }
  0xf4   : > { %1036 = vmatpush3.bf16.msra.mxu0 %v378_v48 }
  0xf7   : > { %1020 = vmatmul.mubr.msk.bf16.vlgmr.msra.gmra.mxu1 %vm248_vm0, %v1074_v32  ;;  %1038 = vmatmul.mubr.msk.bf16.vlgmr.msra.gmra.mxu0 %vm248_vm0, %v1074_v32 }
  0xf8   : > { %1030 = vmatpush3.bf16.msra.mxu1 %v377_v49  ;;  %1031 = vmatprep.mubr.msk.bf16.mxu1 %vm1100_vm1, %v1099_v25 }
  0xf9   : > { %1041 = vmatprep.subr.bf16.mxu1 %v1099_v25 }
  0xff   : > { %1032 = vmatmul.mubr.msk.bf16.vlgmr.msra.gmra.mxu1 %vm248_vm0, %v1074_v32 }
 0x100   : > { %1042 = vmatpush3.bf16.msra.mxu1 %v379_v50  ;;  %1043 = vmatprep.mubr.msk.bf16.mxu1 %vm1100_vm1, %v1099_v25 }
 0x107   : > { %1044 = vmatmul.mubr.msk.bf16.vlgmr.msra.gmra.mxu1 %vm248_vm0, %v1074_v32 }
 0x19f   : > { %v422_v51 = vpop.f32.mrf.mxu1 }
 0x1a0   : > { %v940_v52 = vpack.c.bf16 %v422_v51, %v422_v51 }
 0x1a1   : > { %v1003_v53 = vpop.f32.mrf.mxu1 }
 0x1a2   : > { %781 = vst.msk [vmem:[%s1197_s27] sm:$0xf] %vm780_vm2, %v940_v52 }
 0x1a3   : > { %v425_v54 = vpop.f32.mrf.mxu1 }
 0x1a4   : > { %v941_v55 = vpack.c.bf16 %v425_v54, %v425_v54 }
 0x1a5   : > { %v1004_v56 = vpop.f32.mrf.mxu1 }
 0x1a6   : > { %782 = vst.msk [vmem:[%s1197_s27 + $0x4] sm:$0xf] %vm780_vm2, %v941_v55 }
 0x1a7   : > { %v463_v57 = vpop.f32.mrf.mxu1 }
 0x1a8   : > { %v942_v58 = vpack.c.bf16 %v463_v57, %v463_v57 }
 0x1a9   : > { %v1009_v59 = vpop.f32.mrf.mxu1 }
 0x1aa   : > { %783 = vst.msk [vmem:[%s1197_s27 + $0x8] sm:$0xf] %vm780_vm2, %v942_v58 }
 0x1ab   : > { %v466_v60 = vpop.f32.mrf.mxu1 }
 0x1ac   : > { %v943_v61 = vpack.c.bf16 %v466_v60, %v466_v60 }
 0x1ad   : > { %v1010_v62 = vpop.f32.mrf.mxu1 }
 0x1ae   : > { %784 = vst.msk [vmem:[%s1197_s27 + $0xc] sm:$0xf] %vm780_vm2, %v943_v61 }
 0x1af   : > { %v504_v63 = vpop.f32.mrf.mxu1  ;;  %v586_v0 = vpop.f32.mrf.mxu0 }
 0x1b0   : > { %v944_v1 = vpack.c.bf16 %v504_v63, %v504_v63  ;;  %v948_v2 = vpack.c.bf16 %v586_v0, %v586_v0 }
 0x1b1   : > { %v1015_v3 = vpop.f32.mrf.mxu1  ;;  %v1027_v4 = vpop.f32.mrf.mxu0 }
 0x1b2   : > { %785 = vst.msk [vmem:[%s1197_s27 + $0x10] sm:$0xf] %vm780_vm2, %v944_v1  ;;  %789 = vst.msk [vmem:[%s1197_s27 + $0x20] sm:$0xf] %vm780_vm2, %v948_v2 }
 0x1b3   : > { %v507_v5 = vpop.f32.mrf.mxu1  ;;  %v589_v6 = vpop.f32.mrf.mxu0 }
 0x1b4   : > { %v945_v7 = vpack.c.bf16 %v507_v5, %v507_v5  ;;  %v949_v8 = vpack.c.bf16 %v589_v6, %v589_v6 }
 0x1b5   : > { %v1016_v9 = vpop.f32.mrf.mxu1  ;;  %v1028_v10 = vpop.f32.mrf.mxu0 }
 0x1b6   : > { %786 = vst.msk [vmem:[%s1197_s27 + $0x14] sm:$0xf] %vm780_vm2, %v945_v7  ;;  %790 = vst.msk [vmem:[%s1197_s27 + $0x24] sm:$0xf] %vm780_vm2, %v949_v8 }
 0x1b7   : > { %v545_v11 = vpop.f32.mrf.mxu1  ;;  %v668_v12 = vpop.f32.mrf.mxu0 }
 0x1b8   : > { %v946_v13 = vpack.c.bf16 %v545_v11, %v545_v11  ;;  %v952_v14 = vpack.c.bf16 %v668_v12, %v668_v12 }
 0x1b9   : > { %v1021_v15 = vpop.f32.mrf.mxu1  ;;  %v1039_v16 = vpop.f32.mrf.mxu0 }
 0x1ba   : > { %787 = vst.msk [vmem:[%s1197_s27 + $0x18] sm:$0xf] %vm780_vm2, %v946_v13  ;;  %793 = vst.msk [vmem:[%s1197_s27 + $0x30] sm:$0xf] %vm780_vm2, %v952_v14 }
 0x1bb   : > { %v548_v17 = vpop.f32.mrf.mxu1  ;;  %v671_v18 = vpop.f32.mrf.mxu0 }
 0x1bc   : > { %v947_v19 = vpack.c.bf16 %v548_v17, %v548_v17  ;;  %v953_v20 = vpack.c.bf16 %v671_v18, %v671_v18 }
 0x1bd   : > { %v1022_v21 = vpop.f32.mrf.mxu1  ;;  %v1040_v22 = vpop.f32.mrf.mxu0 }
 0x1be   : > { %788 = vst.msk [vmem:[%s1197_s27 + $0x1c] sm:$0xf] %vm780_vm2, %v947_v19  ;;  %794 = vst.msk [vmem:[%s1197_s27 + $0x34] sm:$0xf] %vm780_vm2, %v953_v20 }
 0x1bf   : > { %v627_v23 = vpop.f32.mrf.mxu1 }
 0x1c0   : > { %v950_v24 = vpack.c.bf16 %v627_v23, %v627_v23 }
 0x1c1   : > { %v1033_v25 = vpop.f32.mrf.mxu1 }
 0x1c2   : > { %791 = vst.msk [vmem:[%s1197_s27 + $0x28] sm:$0xf] %vm780_vm2, %v950_v24 }
 0x1c3   : > { %v630_v26 = vpop.f32.mrf.mxu1 }
 0x1c4   : > { %v951_v27 = vpack.c.bf16 %v630_v26, %v630_v26 }
 0x1c5   : > { %v1034_v28 = vpop.f32.mrf.mxu1 }
 0x1c6   : > { %792 = vst.msk [vmem:[%s1197_s27 + $0x2c] sm:$0xf] %vm780_vm2, %v951_v27 }
 0x1c7   : > { %v709_v29 = vpop.f32.mrf.mxu1 }
 0x1c8   : > { %v954_v30 = vpack.c.bf16 %v709_v29, %v709_v29 }
 0x1c9   : > { %v1045_v31 = vpop.f32.mrf.mxu1 }
 0x1ca   : > { %795 = vst.msk [vmem:[%s1197_s27 + $0x38] sm:$0xf] %vm780_vm2, %v954_v30 }
 0x1cb   : > { %v712_v32 = vpop.f32.mrf.mxu1 }
 0x1cc   : > { %v955_v33 = vpack.c.bf16 %v712_v32, %v712_v32 }
 0x1cd   : > { %v1046_v34 = vpop.f32.mrf.mxu1 }
 0x1ce   : > { %796 = vst.msk [vmem:[%s1197_s27 + $0x3c] sm:$0xf] %vm780_vm2, %v955_v33 }
 0x1cf PF: > { %s13_s14 = sadd.s32 1, %s1097_s14   ;;  %s1244_s12 = smov %s1093_s13 }
 0x1d0   : > { %p10_p5 = scmp.ge.s32.totalorder %s13_s14, 4   ;;  %s1245_s13 = smov %s1247_s15 }
 0x1d2   :  { %12 = sbr.rel (!%p10_p5) target bundleno = 2 (0x2), region = 62 }

</bundles_post_ra>
